<compile_context>
chip_gen: v6e
topology: v6e:2x2x1
jax: 0.10.0
libtpu: 0.0.40
codegen_flags: <defaults>
</compile_context>

<pallas_src>
import math

import jax
import jax.numpy as jnp
from jax.experimental import pallas as pl
from jax.experimental.pallas import tpu as pltpu


_A = math.sqrt(2.0 / math.pi)        # sqrt(2/pi)
_B = 0.044715 * _A                   # folded: sqrt(2/pi) * 0.044715

_LANE_CANDIDATES = (512, 256, 128)   # lane-dense column widths (multiples of 128)
_TARGET_TILE_BYTES = 2 * 1024 * 1024  # ~2 MiB per block; 4 buffers in flight ~ 8 MiB
_MIN_PALLAS_ELEMS = 64 * 1024        # below this, XLA fusion beats kernel overhead


def _gelu_kernel(x_ref, o_ref):
    # 0.5 * x * (1 + tanh(sqrt(2/pi) * (x + 0.044715 * x^3)))
    # == x * (0.5 + 0.5 * tanh(x * (A + B * x^2)))   with A, B folded above.
    x = x_ref[...].astype(jnp.float32)      # f32 compute (v5e has no bf16 VPU/EUP)
    inner = x * (_A + _B * (x * x))
    y = x * (0.5 + 0.5 * jnp.tanh(inner))   # tanh lands on the EUP slot
    o_ref[...] = y.astype(o_ref.dtype)


def _gelu_jax_ref(x):
    xf = x.astype(jnp.float32)
    y = 0.5 * xf * (1.0 + jnp.tanh(_A * (xf + 0.044715 * xf * xf * xf)))
    return y.astype(x.dtype)


def gelu(x: jax.Array, *, min_pallas_elems: int = _MIN_PALLAS_ELEMS) -> jax.Array:
    """BERT tanh-approx GELU, elementwise over any-shaped input."""
    total = x.size
    if total == 0:
        return x
    if total < min_pallas_elems:
        # Tiny tensors: pallas_call fixed overhead dominates; let XLA fuse it.
        return _gelu_jax_ref(x)

    orig_shape = x.shape
    itemsize = jnp.dtype(x.dtype).itemsize

    # Pick the widest lane-dense column count that divides the element count,
    # so the 2-D view is a free reshape (no HBM copy).
    cols = None
    for c in _LANE_CANDIDATES:
        if total % c == 0:
            cols = c
            break

    padded = False
    if cols is None:
        # Ragged size: one unavoidable pad of the flattened array up to a
        # 128-lane multiple (padded zeros -> gelu(0) = 0, sliced off below).
        cols = 128
        padded_total = pl.cdiv(total, cols) * cols
        flat = jnp.pad(x.reshape(-1), (0, padded_total - total))
        rows = padded_total // cols
        x2d = flat.reshape(rows, cols)
        padded = True
    else:
        rows = total // cols
        x2d = x.reshape(rows, cols)

    # Rows per grid step: ~2 MiB per block, dtype-aware, multiple of 8 sublanes.
    # No row padding — the last block may be partial (OOB writes are dropped).
    tile_r = max(8, (_TARGET_TILE_BYTES // (cols * itemsize)) // 8 * 8)
    if rows <= tile_r:
        if rows >= 16:
            # Keep >= 2 grid steps so both v7x TensorCores get work.
            tile_r = (((rows + 1) // 2) + 7) // 8 * 8
        else:
            tile_r = rows  # block equals full array dims -> always legal
    grid_r = pl.cdiv(rows, tile_r)

    out2d = pl.pallas_call(
        _gelu_kernel,
        out_shape=jax.ShapeDtypeStruct((rows, cols), x.dtype),
        grid_spec=pl.GridSpec(
            grid=(grid_r,),
            in_specs=[pl.BlockSpec((tile_r, cols), lambda i: (i, 0))],
            out_specs=pl.BlockSpec((tile_r, cols), lambda i: (i, 0)),
        ),
        compiler_params=pltpu.CompilerParams(
            dimension_semantics=("parallel",),
        ),
        cost_estimate=pl.CostEstimate(
            flops=8 * rows * cols,
            transcendentals=rows * cols,
            bytes_accessed=2 * rows * cols * itemsize,
        ),
    )(x2d)

    if padded:
        return out2d.reshape(-1)[:total].reshape(orig_shape)
    return out2d.reshape(orig_shape)


if __name__ == "__main__":
    key = jax.random.PRNGKey(0)

    # Spec-consistent small shape: batch=2, seq=8, hidden=32.
    x_small = jax.random.normal(key, (2, 8, 32), dtype=jnp.float32)

    # 1) Small input: fast XLA-fusion fallback path.
    out_small = gelu(x_small)
    # 2) Same small input forced through the Pallas kernel (no padding, grid=1).
    out_small_pallas = gelu(x_small, min_pallas_elems=0)

    k1, k2 = jax.random.split(key)
    # 3) Larger aligned input: Pallas path, free reshape, uneven 2-step grid.
    x_big = jax.random.normal(k1, (6, 256, 512), dtype=jnp.float32)
    out_big = gelu(x_big)
    # 4) Ragged size (not a multiple of 128): padded Pallas path + uneven grid.
    x_rag = jax.random.normal(k2, (5, 333, 97), dtype=jnp.float32)
    out_rag = gelu(x_rag)

    jax.block_until_ready((out_small, out_small_pallas, out_big, out_rag))

    for x_, out_ in ((x_small, out_small), (x_small, out_small_pallas),
                     (x_big, out_big), (x_rag, out_rag)):
        assert out_.shape == x_.shape and out_.dtype == x_.dtype
        ref_ = _gelu_jax_ref(x_)
        assert jnp.allclose(out_, ref_, atol=1e-6, rtol=1e-6), \
            float(jnp.max(jnp.abs(out_ - ref_)))

    print("KERNEL_OK")
</pallas_src>

<mosaic_0001>
module attributes {stable_mosaic.version = 11 : i64} {
  func.func @_gelu_kernel(%arg0: i32, %arg1: memref<1x512xf32, #tpu.memory_space<vmem>>, %arg2: memref<1x512xf32, #tpu.memory_space<vmem>>) attributes {dimension_semantics = [#tpu.dimension_semantics<parallel>], iteration_bounds = array<i64: 1>, scalar_prefetch = 0 : i64, scratch_operands = 0 : i64, tpu.core_type = #tpu.core_type<tc>, window_params = [{transform_indices = @transform_0, window_bounds = array<i64: 1, 512>}, {transform_indices = @transform_1, window_bounds = array<i64: 1, 512>}]} {
    %c0 = arith.constant 0 : index
    %c0_0 = arith.constant 0 : index
    %0 = vector.load %arg1[%c0, %c0_0] : memref<1x512xf32, #tpu.memory_space<vmem>>, vector<1x512xf32>
    %1 = arith.mulf %0, %0 : vector<1x512xf32>
    %cst = arith.constant 0.0356774069 : f32
    %2 = vector.broadcast %cst : f32 to vector<1x512xf32>
    %3 = arith.mulf %2, %1 : vector<1x512xf32>
    %cst_1 = arith.constant 0.797884583 : f32
    %4 = vector.broadcast %cst_1 : f32 to vector<1x512xf32>
    %5 = arith.addf %4, %3 : vector<1x512xf32>
    %6 = arith.mulf %0, %5 : vector<1x512xf32>
    %7 = math.tanh %6 : vector<1x512xf32>
    %cst_2 = arith.constant 5.000000e-01 : f32
    %8 = vector.broadcast %cst_2 : f32 to vector<1x512xf32>
    %9 = arith.mulf %8, %7 : vector<1x512xf32>
    %cst_3 = arith.constant 5.000000e-01 : f32
    %10 = vector.broadcast %cst_3 : f32 to vector<1x512xf32>
    %11 = arith.addf %10, %9 : vector<1x512xf32>
    %12 = arith.mulf %0, %11 : vector<1x512xf32>
    %c0_4 = arith.constant 0 : index
    %c0_5 = arith.constant 0 : index
    %13 = vector.load %arg2[%c0_4, %c0_5] : memref<1x512xf32, #tpu.memory_space<vmem>>, vector<1x512xf32>
    tpu.vector_store %arg2[%c0_4, %c0_5], %12 {strides = array<i32>} : memref<1x512xf32, #tpu.memory_space<vmem>>, vector<1x512xf32>,
    return
  }
  func.func @transform_0(%arg0: i32) -> (i32, i32) {
    %c0_i32 = arith.constant 0 : i32
    %c0_i32_0 = arith.constant 0 : i32
    return %arg0, %c0_i32 : i32, i32
  }
  func.func @transform_1(%arg0: i32) -> (i32, i32) {
    %c0_i32 = arith.constant 0 : i32
    %c0_i32_0 = arith.constant 0 : i32
    return %arg0, %c0_i32 : i32, i32
  }
}

</mosaic_0001>

<bundles_post_ra>
// kernel: tpu_custom_call.1
= control target key start
LH: loop header
LB: loop body
LE: loop exit
PB: predicated region body
PF: predicated region fallthrough
CT: control target
= control target key end

     0   :  { %6 = vsyncpa [#allocation3], 0  ;;  %s116_s0 = inlined_call_operand.hbm [shape: f32[1,512], index: 0, kind: input, shape index: {}]   ;;  %s117_s1 = inlined_call_operand.hbm [shape: f32[1,512], index: 1, kind: output, shape index: {}]  }
   0x1   :  { %7 = vsyncpa [#allocation4], 0  ;;  %s98_s6 = smov [#allocation2]  }
   0x2   :  { %s14_s7 = sshll.u32 %s98_s6, 4  ;;  %s15_s7 = int_to_ptr.vmem [resolvable:$true] %s14_s7 }
   0x3   :  { %s62_s8 = scalar_lea.vmem %s15_s7, 64  ;;  %p67_p1 = scmp.lt.s32.totalorder %s15_s7, %s15_s7 }
   0x4   :  { %p63_p0 = scmp.ne.s32.totalorder %s15_s7, %s62_s8  ;;  %p68_p2 = scmp.lt.s32.totalorder %s62_s8, %s62_s8 }
   0x6   :  { %p69_p3 = por %p68_p2, %p67_p1 }
   0x8   :  { %p70_p4 = pnand %p69_p3, %p63_p0 }
   0xa   :  { %73 = shalt.err (!%p70_p4)
}
   0xb   :  { %17 = dma.hbm_to_vmem [thread:$0]  %s116_s0, 64, %s15_s7, [#allocation3]  }
   0xc   :  { %94 = dma.done.wait [#allocation3], 64  }
   0xd   :  { %95 = vsyncadd [#allocation3], 4294967232  ;;  %v21_v0 = vld [vmem:[#allocation2] sm:$0xf]  ;;  %v30_v6 = vlaneseq  ;;  %s99_s11 = smov [#allocation5]  }
   0xe   :  { %v22_v1 = vmul.f32 %v21_v0, %v21_v0  ;;  %s41_s12 = sshll.u32 %s99_s11, 4  ;;  %s42_s12 = int_to_ptr.vmem [resolvable:$true] %s41_s12 }
   0xf   :  { %vm32_vm0 = vcmp.lt.s32.totalorder %v30_v6, 512  ;;  %s74_s13 = scalar_lea.vmem %s42_s12, 64  ;;  %p79_p6 = scmp.lt.s32.totalorder %s42_s12, %s42_s12 }
  0x10   :  { %v23_v2 = vmul.f32 0.035677407, %v22_v1  ;;  %p75_p5 = scmp.ne.s32.totalorder %s42_s12, %s74_s13  ;;  %p80_p7 = scmp.lt.s32.totalorder %s74_s13, %s74_s13 }
  0x12   :  { %v24_v3 = vadd.f32 0.7978846, %v23_v2  ;;  %p81_p8 = por %p80_p7, %p79_p6 }
  0x14   :  { %v25_v4 = vmul.f32 %v24_v3, %v21_v0  ;;  %p82_p9 = pnand %p81_p8, %p75_p5 }
  0x16   :  { %52 = vtanh.f32 %v25_v4 }
  0x23   :  { %v53_v5 = vpop.eup %52 }
  0x24   :  { %v27_v7 = vmul.f32 0.5, %v53_v5 }
  0x26   :  { %v28_v8 = vadd.f32 0.5, %v27_v7 }
  0x28   :  { %v29_v9 = vmul.f32 %v28_v8, %v21_v0 }
  0x2a   :  { %34 = vst.msk [vmem:[#allocation5] sm:$0xf] %vm32_vm0, %v29_v9 }
  0x2b   :  { %85 = shalt.err (!%p82_p9)
}
  0x2c   :  { %44 = dma.vmem_to_hbm [thread:$0]  %s42_s12, 64, %s117_s1, [#allocation4]  }
  0x2d   :  { %96 = dma.done.wait [#allocation4], 64  }
  0x2e   :  { %97 = vsyncadd [#allocation4], 4294967232 }
  0x2f   :  { %48 = vsyncpa [#allocation3], 1 }
  0x30   :  { %49 = vsyncpa [#allocation4], 1 }

</bundles_post_ra>
